<compile_context>
chip_gen: v7x
topology: tpu7x:2x2x1
jax: 0.10.0
libtpu: 0.0.40
codegen_flags: <defaults>
</compile_context>

<pallas_src>
import functools

import jax
import jax.numpy as jnp
from jax.experimental import pallas as pl
from jax.experimental.pallas import tpu as pltpu


def _round_down8(x):
    return max(8, (int(x) // 8) * 8)


def _focal_loss_kernel(logits_ref, targets_ref, alpha_ref, out_ref, *,
                       gamma, tile_n, n_rows, blocks_per_par):
    p = pl.program_id(0)   # parallel (megacore) slice
    j = pl.program_id(1)   # reduction step within the slice

    @pl.when(j == 0)
    def _init():
        out_ref[...] = jnp.zeros_like(out_ref)

    logits = logits_ref[...].astype(jnp.float32)      # [tile_n, C]
    targets = targets_ref[...]                        # [tile_n, 1] int32
    alpha_row = alpha_ref[...].astype(jnp.float32)    # [1, C]

    tn, c = logits.shape

    # One-hot target mask via iota compare (replaces torch scatter_).
    class_ids = jax.lax.broadcasted_iota(jnp.int32, (tn, c), 1)
    class_mask = (class_ids == targets).astype(jnp.float32)          # [tn, C]

    # Numerically-stable log-softmax of the target class.  `shifted` is
    # computed once and reused for both the exp-sum and the target gather.
    m = jnp.max(logits, axis=-1, keepdims=True)                      # [tn, 1]
    shifted = logits - m                                             # [tn, C]
    denom = jnp.sum(jnp.exp(shifted), axis=-1, keepdims=True)        # [tn, 1]
    shifted_t = jnp.sum(shifted * class_mask, axis=-1, keepdims=True)  # [tn,1]
    log_p = shifted_t - jnp.log(denom)                               # [tn, 1]
    probs = jnp.exp(log_p)                                           # [tn, 1]

    # Per-sample alpha = alpha[target], gathered through the one-hot mask.
    alpha_s = jnp.sum(class_mask * alpha_row, axis=-1, keepdims=True)  # [tn,1]

    one_minus_p = jnp.maximum(1.0 - probs, 0.0)
    g = float(gamma)
    if g == 2.0:                      # common case: one VPU multiply, no pow
        focal = one_minus_p * one_minus_p
    elif g == 1.0:
        focal = one_minus_p
    elif g == 0.0:
        focal = jnp.ones_like(one_minus_p)
    else:
        focal = jnp.power(one_minus_p, jnp.float32(g))

    batch_loss = -alpha_s * focal * log_p                            # [tn, 1]

    # Zero rows past the true batch size (partial last tile / clamped
    # duplicate blocks).  jnp.where keeps NaNs from padded garbage out.
    blk = p * blocks_per_par + j
    row = blk * tile_n + jax.lax.broadcasted_iota(jnp.int32, (tn, 1), 0)
    masked = jnp.where(row < n_rows, batch_loss, 0.0)
    partial = jnp.sum(masked)                                        # rank-0

    # Accumulate into element [0,0] of this slice's resident output block
    # (whole-block vector op; no scalar read-modify-write / VMEM stride).
    r = jax.lax.broadcasted_iota(jnp.int32, out_ref.shape, 0)
    l = jax.lax.broadcasted_iota(jnp.int32, out_ref.shape, 1)
    sel = (r == 0) & (l == 0)
    out_ref[...] += jnp.where(sel, partial, 0.0)


def focal_loss(logits, targets, alpha=None, gamma=2.0, size_average=True,
               tile_n=None, num_parallel=2):
    """Pallas FocalLoss forward.

    logits:  [N, C] float (any float dtype; upcast to f32 inside the kernel)
    targets: [N]    int class indices
    alpha:   [C] or [C, 1] float (defaults to ones, like the torch module)
    Returns a scalar float32 (mean over batch if size_average else sum).
    """
    n, c = logits.shape
    if alpha is None:
        alpha = jnp.ones((c,), jnp.float32)
    alpha_row = jnp.asarray(alpha, jnp.float32).reshape(1, c)
    targets2d = jnp.asarray(targets, jnp.int32).reshape(n, 1)

    if tile_n is None:
        # ~6 MiB per (double-buffered) logits tile: safe under the scoped
        # VMEM defaults on every generation, including v7x (64 MiB physical).
        bytes_per_row = c * max(jnp.dtype(logits.dtype).itemsize, 4)
        budget_rows = max(8, (6 * 1024 * 1024) // bytes_per_row)
        tile_n = min(1024, budget_rows, n)
    if int(tile_n) >= n:
        tile_n = n                 # single full-extent block (valid layout)
    else:
        tile_n = _round_down8(tile_n)

    total_blocks = pl.cdiv(n, tile_n)
    num_par = num_parallel if total_blocks >= num_parallel else 1
    bpp = pl.cdiv(total_blocks, num_par)      # reduction steps per slice
    grid = (num_par, bpp)

    def _row_block(pi, ji):
        # Clamp so duplicated trailing steps re-read the last real block
        # (their contribution is zeroed by the in-kernel row mask).
        return (jnp.minimum(pi * bpp + ji, total_blocks - 1), 0)

    kernel = functools.partial(
        _focal_loss_kernel, gamma=float(gamma), tile_n=int(tile_n),
        n_rows=n, blocks_per_par=int(bpp))

    itemsize = jnp.dtype(logits.dtype).itemsize
    cost = pl.CostEstimate(
        flops=8 * n * c,
        transcendentals=n * c + 2 * n,
        bytes_accessed=n * c * itemsize + n * 4 + c * 4 + num_par * 8 * 128 * 4,
    )

    partials = pl.pallas_call(
        kernel,
        out_shape=jax.ShapeDtypeStruct((num_par * 8, 128), jnp.float32),
        grid_spec=pltpu.PrefetchScalarGridSpec(
            num_scalar_prefetch=0,
            grid=grid,
            in_specs=[
                pl.BlockSpec((tile_n, c), _row_block),        # logits tile
                pl.BlockSpec((tile_n, 1), _row_block),        # targets tile
                pl.BlockSpec((1, c), lambda pi, ji: (0, 0)),  # alpha (resident)
            ],
            out_specs=pl.BlockSpec((8, 128), lambda pi, ji: (pi, 0)),
        ),
        compiler_params=pltpu.CompilerParams(
            dimension_semantics=("parallel", "arbitrary"),
            vmem_limit_bytes=32 * 1024 * 1024,
        ),
        cost_estimate=cost,
    )(logits, targets2d, alpha_row)

    total = jnp.sum(partials)
    if size_average:
        total = total / jnp.float32(n)
    return total


def _focal_loss_ref(logits, targets, alpha, gamma, size_average):
    # Pure-JAX reference mirroring the torch forward (for sanity check).
    p = jax.nn.softmax(logits.astype(jnp.float32), axis=-1)
    n, c = logits.shape
    mask = jax.nn.one_hot(targets, c, dtype=jnp.float32)
    probs = jnp.sum(p * mask, axis=1, keepdims=True)
    log_p = jnp.log(probs)
    alpha_s = jnp.asarray(alpha, jnp.float32).reshape(-1)[targets].reshape(-1, 1)
    batch_loss = -alpha_s * jnp.power(1.0 - probs, gamma) * log_p
    return jnp.mean(batch_loss) if size_average else jnp.sum(batch_loss)


if __name__ == "__main__":
    key = jax.random.PRNGKey(0)
    k1, k2, k3 = jax.random.split(key, 3)

    N, C = 20, 32  # small; N deliberately NOT a multiple of the tile size
    logits = jax.random.normal(k1, (N, C), jnp.float32)
    targets = jax.random.randint(k2, (N,), 0, C, jnp.int32)
    alpha = jax.random.uniform(k3, (C, 1), jnp.float32, minval=0.5, maxval=1.5)

    # tile_n=8 forces multiple grid steps (partial last tile, block clamping,
    # both parallel slices, accumulator phases) even at this toy size.
    loss = focal_loss(logits, targets, alpha=alpha, gamma=2.0,
                      size_average=True, tile_n=8)
    loss = jax.block_until_ready(loss)
    ref = _focal_loss_ref(logits, targets, alpha, 2.0, True)
    assert jnp.allclose(loss, ref, rtol=1e-5, atol=1e-5), (loss, ref)

    # Also exercise the auto-tiled path and size_average=False (sum).
    loss2 = focal_loss(logits, targets, alpha=alpha, gamma=2.0,
                       size_average=False)
    loss2 = jax.block_until_ready(loss2)
    ref2 = _focal_loss_ref(logits, targets, alpha, 2.0, False)
    assert jnp.allclose(loss2, ref2, rtol=1e-5, atol=1e-5), (loss2, ref2)

    # Non-special gamma path (jnp.power) + default alpha (ones).
    loss3 = focal_loss(logits, targets, alpha=None, gamma=1.5,
                       size_average=True, tile_n=8)
    loss3 = jax.block_until_ready(loss3)
    ref3 = _focal_loss_ref(logits, targets, jnp.ones((C,)), 1.5, True)
    assert jnp.allclose(loss3, ref3, rtol=1e-5, atol=1e-5), (loss3, ref3)

    print("KERNEL_OK")
</pallas_src>

<mosaic_0001>
module attributes {stable_mosaic.version = 11 : i64} {
  func.func @_focal_loss_kernel(%arg0: i32, %arg1: i32, %arg2: memref<8x32xf32, #tpu.memory_space<vmem>>, %arg3: memref<8x1xi32, #tpu.memory_space<vmem>>, %arg4: memref<1x32xf32, #tpu.memory_space<vmem>>, %arg5: memref<8x128xf32, #tpu.memory_space<vmem>>) attributes {dimension_semantics = [#tpu.dimension_semantics<parallel>, #tpu.dimension_semantics<arbitrary>], iteration_bounds = array<i64: 2, 2>, scalar_prefetch = 0 : i64, scratch_operands = 0 : i64, tpu.core_type = #tpu.core_type<tc>, window_params = [{transform_indices = @transform_0, window_bounds = array<i64: 8, 32>}, {transform_indices = @transform_1, window_bounds = array<i64: 8, 1>}, {pipeline_mode = #tpu.pipeline_mode<synchronous>, transform_indices = @transform_2, window_bounds = array<i64: 1, 32>}, {transform_indices = @transform_3, window_bounds = array<i64: 8, 128>}]} {
    %c0_i32 = arith.constant 0 : i32
    %0 = arith.cmpi eq, %arg1, %c0_i32 : i32
    %1 = arith.extui %0 : i1 to i32
    %c0_i32_0 = arith.constant 0 : i32
    %2 = arith.cmpi ne, %1, %c0_i32_0 : i32
    scf.if %2 {
      %cst_21 = arith.constant 0.000000e+00 : f32
      %64 = vector.broadcast %cst_21 : f32 to vector<8x128xf32>
      %c0_22 = arith.constant 0 : index
      %c0_23 = arith.constant 0 : index
      %65 = vector.load %arg5[%c0_22, %c0_23] : memref<8x128xf32, #tpu.memory_space<vmem>>, vector<8x128xf32>
      tpu.vector_store %arg5[%c0_22, %c0_23], %64 {strides = array<i32>} : memref<8x128xf32, #tpu.memory_space<vmem>>, vector<8x128xf32>,
    } else {
    }
    %c0 = arith.constant 0 : index
    %c0_1 = arith.constant 0 : index
    %3 = vector.load %arg2[%c0, %c0_1] : memref<8x32xf32, #tpu.memory_space<vmem>>, vector<8x32xf32>
    %c0_2 = arith.constant 0 : index
    %c0_3 = arith.constant 0 : index
    %4 = vector.load %arg3[%c0_2, %c0_3] : memref<8x1xi32, #tpu.memory_space<vmem>>, vector<8x1xi32>
    %c0_4 = arith.constant 0 : index
    %c0_5 = arith.constant 0 : index
    %5 = vector.load %arg4[%c0_4, %c0_5] : memref<1x32xf32, #tpu.memory_space<vmem>>, vector<1x32xf32>
    %6 = tpu.iota {dimensions = array<i32: 1>} : vector<8x32xi32>
    %7 = vector.broadcast %4 : vector<8x1xi32> to vector<8x32xi32>
    %8 = arith.cmpi eq, %6, %7 : vector<8x32xi32>
    %9 = arith.extui %8 : vector<8x32xi1> to vector<8x32xi32>
    %10 = arith.sitofp %9 : vector<8x32xi32> to vector<8x32xf32>
    %cst = arith.constant dense<0xFF800000> : vector<8xf32>
    %11 = vector.multi_reduction <maximumf>, %3, %cst [1] : vector<8x32xf32> to vector<8xf32>
    %12 = vector.shape_cast %11 : vector<8xf32> to vector<8x1xf32>
    %13 = vector.broadcast %12 : vector<8x1xf32> to vector<8x32xf32>
    %14 = arith.subf %3, %13 : vector<8x32xf32>
    %15 = math.exp %14 : vector<8x32xf32>
    %cst_6 = arith.constant dense<0.000000e+00> : vector<8xf32>
    %16 = vector.multi_reduction <add>, %15, %cst_6 [1] : vector<8x32xf32> to vector<8xf32>
    %17 = vector.shape_cast %16 : vector<8xf32> to vector<8x1xf32>
    %18 = arith.mulf %14, %10 : vector<8x32xf32>
    %cst_7 = arith.constant dense<0.000000e+00> : vector<8xf32>
    %19 = vector.multi_reduction <add>, %18, %cst_7 [1] : vector<8x32xf32> to vector<8xf32>
    %20 = vector.shape_cast %19 : vector<8xf32> to vector<8x1xf32>
    %21 = math.log %17 : vector<8x1xf32>
    %22 = arith.subf %20, %21 : vector<8x1xf32>
    %23 = math.exp %22 : vector<8x1xf32>
    %24 = vector.broadcast %5 : vector<1x32xf32> to vector<8x32xf32>
    %25 = arith.mulf %10, %24 : vector<8x32xf32>
    %cst_8 = arith.constant dense<0.000000e+00> : vector<8xf32>
    %26 = vector.multi_reduction <add>, %25, %cst_8 [1] : vector<8x32xf32> to vector<8xf32>
    %27 = vector.shape_cast %26 : vector<8xf32> to vector<8x1xf32>
    %cst_9 = arith.constant 1.000000e+00 : f32
    %28 = vector.broadcast %cst_9 : f32 to vector<8x1xf32>
    %29 = arith.subf %28, %23 : vector<8x1xf32>
    %cst_10 = arith.constant 0.000000e+00 : f32
    %30 = vector.broadcast %cst_10 : f32 to vector<8x1xf32>
    %31 = arith.maximumf %29, %30 : vector<8x1xf32>
    %32 = arith.mulf %31, %31 : vector<8x1xf32>
    %cst_11 = arith.constant 0.000000e+00 : f32
    %33 = vector.broadcast %cst_11 : f32 to vector<8x1xf32>
    %34 = arith.subf %33, %27 : vector<8x1xf32>
    %35 = arith.mulf %34, %32 : vector<8x1xf32>
    %36 = arith.mulf %35, %22 : vector<8x1xf32>
    %c2_i32 = arith.constant 2 : i32
    %37 = arith.muli %arg0, %c2_i32 : i32
    %38 = arith.addi %37, %arg1 : i32
    %c8_i32 = arith.constant 8 : i32
    %39 = arith.muli %38, %c8_i32 : i32
    %40 = tpu.iota {dimensions = array<i32: 0>} : vector<8x1xi32>
    %41 = vector.broadcast %39 : i32 to vector<8x1xi32>
    %42 = arith.addi %41, %40 : vector<8x1xi32>
    %c20_i32 = arith.constant 20 : i32
    %43 = vector.broadcast %c20_i32 : i32 to vector<8x1xi32>
    %44 = arith.cmpi slt, %42, %43 : vector<8x1xi32>
    %cst_12 = arith.constant 0.000000e+00 : f32
    %45 = vector.broadcast %cst_12 : f32 to vector<8x1xf32>
    %46 = arith.select %44, %36, %45 : vector<8x1xi1>, vector<8x1xf32>
    %47 = vector.shape_cast %46 : vector<8x1xf32> to vector<1x8x1xf32>
    %cst_13 = arith.constant dense<0.000000e+00> : vector<1xf32>
    %48 = vector.multi_reduction <add>, %47, %cst_13 [1, 2] : vector<1x8x1xf32> to vector<1xf32>
    %49 = vector.shape_cast %48 : vector<1xf32> to vector<1x1x1xf32>
    %50 = vector.extract %49[0, 0, 0] : f32 from vector<1x1x1xf32>
    %51 = tpu.iota {dimensions = array<i32: 0>} : vector<8x128xi32>
    %52 = tpu.iota {dimensions = array<i32: 1>} : vector<8x128xi32>
    %c0_i32_14 = arith.constant 0 : i32
    %53 = vector.broadcast %c0_i32_14 : i32 to vector<8x128xi32>
    %54 = arith.cmpi eq, %51, %53 : vector<8x128xi32>
    %c0_i32_15 = arith.constant 0 : i32
    %55 = vector.broadcast %c0_i32_15 : i32 to vector<8x128xi32>
    %56 = arith.cmpi eq, %52, %55 : vector<8x128xi32>
    %57 = arith.andi %54, %56 : vector<8x128xi1>
    %c0_16 = arith.constant 0 : index
    %c0_17 = arith.constant 0 : index
    %58 = vector.load %arg5[%c0_16, %c0_17] : memref<8x128xf32, #tpu.memory_space<vmem>>, vector<8x128xf32>
    %cst_18 = arith.constant 0.000000e+00 : f32
    %59 = vector.broadcast %50 : f32 to vector<8x128xf32>
    %60 = vector.broadcast %cst_18 : f32 to vector<8x128xf32>
    %61 = arith.select %57, %59, %60 : vector<8x128xi1>, vector<8x128xf32>
    %62 = arith.addf %58, %61 : vector<8x128xf32>
    %c0_19 = arith.constant 0 : index
    %c0_20 = arith.constant 0 : index
    %63 = vector.load %arg5[%c0_19, %c0_20] : memref<8x128xf32, #tpu.memory_space<vmem>>, vector<8x128xf32>
    tpu.vector_store %arg5[%c0_19, %c0_20], %62 {strides = array<i32>} : memref<8x128xf32, #tpu.memory_space<vmem>>, vector<8x128xf32>,
    return
  }
  func.func @transform_0(%arg0: i32, %arg1: i32) -> (i32, i32) {
    %c2_i32 = arith.constant 2 : i32
    %0 = arith.muli %arg0, %c2_i32 : i32
    %1 = arith.addi %0, %arg1 : i32
    %c2_i32_0 = arith.constant 2 : i32
    %2 = arith.minsi %1, %c2_i32_0 : i32
    %c0_i32 = arith.constant 0 : i32
    %c0_i32_1 = arith.constant 0 : i32
    return %2, %c0_i32 : i32, i32
  }
  func.func @transform_1(%arg0: i32, %arg1: i32) -> (i32, i32) {
    %c2_i32 = arith.constant 2 : i32
    %0 = arith.muli %arg0, %c2_i32 : i32
    %1 = arith.addi %0, %arg1 : i32
    %c2_i32_0 = arith.constant 2 : i32
    %2 = arith.minsi %1, %c2_i32_0 : i32
    %c0_i32 = arith.constant 0 : i32
    %c0_i32_1 = arith.constant 0 : i32
    return %2, %c0_i32 : i32, i32
  }
  func.func @transform_2(%arg0: i32, %arg1: i32) -> (i32, i32) {
    %c0_i32 = arith.constant 0 : i32
    %c0_i32_0 = arith.constant 0 : i32
    %c0_i32_1 = arith.constant 0 : i32
    return %c0_i32, %c0_i32_0 : i32, i32
  }
  func.func @transform_3(%arg0: i32, %arg1: i32) -> (i32, i32) {
    %c0_i32 = arith.constant 0 : i32
    %c0_i32_0 = arith.constant 0 : i32
    return %arg0, %c0_i32 : i32, i32
  }
}

</mosaic_0001>

<bundles_post_ra>
// kernel: tpu_custom_call.1
= control target key start
LH: loop header
LB: loop body
LE: loop exit
PB: predicated region body
PF: predicated region fallthrough
CT: control target
= control target key end

     0   :  { %8 = vsyncpa [#allocation3], 0  ;;  %s816_s0 = inlined_call_operand.vmem [shape: f32[20,32], index: 0, kind: input, shape index: {}]   ;;  %s817_s1 = inlined_call_operand.vmem [shape: s32[20,1], index: 1, kind: input, shape index: {}]   ;;  %s818_s2 = inlined_call_operand.vmem [shape: f32[1,32], index: 2, kind: input, shape index: {}]   ;;  %s819_s3 = inlined_call_operand.hbm [shape: f32[16,128], index: 3, kind: output, shape index: {}]  }
   0x1   :  { %10 = vsyncpa [#allocation3 + $0x1], 0  ;;  %s658_s12 = smov 0   ;;  %s660_s13 = smov 0  }
   0x2   :  { %s662_s14 = smov 0   ;;  %s664_s15 = smov 0  }
   0x3   :  { %s666_s16 = smov 0   ;;  %s668_s17 = smov 0  }
   0x4   :  { %s670_s18 = smov 0   ;;  %s672_s19 = smov 0  }
   0x5 LB: > { %s426_s20 = sadd.s32 4294967295, %s632_s19   ;;  %s427_s21 = sadd.s32 4294967294, %s632_s19   ;;  %s632_s19 = sphi %s672_s19, %s16_s19   ;;  %s628_s18 = sphi %s670_s18, %s828_s18   ;;  %s624_s17 = sphi %s668_s17, %s827_s17   ;;  %s620_s16 = sphi %s666_s16, %s826_s16   ;;  %s616_s15 = sphi %s664_s15, %s825_s15   ;;  %s612_s14 = sphi %s662_s14, %s824_s14   ;;  %s608_s13 = sphi %s660_s13, %s823_s13   ;;  %s604_s12 = sphi %s658_s12, %s822_s12  }
   0x6   : > { %s25_s22 = sadd.s32 1, %s624_s17  ;;  %s28_s23 = sadd.s32 1, %s628_s18 }
   0x7   : > { %p26_p0 = scmp.ge.s32.totalorder %s25_s22, 2  ;;  %p134_p1 = scmp.ne.s32.totalorder %s612_s14, %s608_s13 }
   0x8   : > { %p135_p2 = scmp.eq.s32.totalorder %s426_s20, 3  ;;  %p140_p4 = scmp.ne.s32.totalorder %s608_s13, %s604_s12 }
   0x9   : > { %s830_s22 = smov (%p26_p0, %s25_s22), 0  ;;  %s832_s23 = smov (!%p26_p0, %s28_s23), %s628_s18 }
   0xa   : > { %p707_p3 = por %p135_p2, %p134_p1  ;;  %p30_p5 = scmp.ge.s32.totalorder %s832_s23, 2 }
   0xb   : > { %p141_p6 = scmp.eq.s32.totalorder %s427_s21, 3  ;;  %p434_p7 = scmp.ge.s32.totalorder %s632_s19, 1 }
   0xc   : > { %p192_p8 = scmp.lt.s32.totalorder %s632_s19, 5  ;;  %s834_s23 = smov (%p30_p5, %s832_s23), 0 }
   0xd   : > { %p717_p9 = por %p141_p6, %p140_p4  ;;  %s121_s26 = ssub.s32 %s628_s18, %s834_s23 }
   0xe   : > { %p193_p10 = pnand %p434_p7, %p192_p8  ;;  %s124_s27 = sadd.s32 1, %s612_s14 }
   0xf   : > { %p122_p11 = scmp.eq.s32.totalorder %s121_s26, 0  ;;  %s224_s29 = sand.u32 (!%p193_p10), 1, %s608_s13  }
  0x10   : > { %196 = sbr.rel (%p193_p10) target bundleno = 595 (0x253), region = 32  ;;  %s436_s30 = sshll.u32 (!%p193_p10), %s620_s16, 1 }
  0x11   : > { %s725_s28 = scalar_select %p122_p11, %s612_s14, %s124_s27  }
  0x12   : > { %s435_s4 = sshll.u32 (!%p193_p10), %s224_s29, 3  ;;  %s732_s5 = sadd.s32 (!%p193_p10), %s616_s15, %s436_s30 }
  0x13   : > { %p229_p12 = scmp.lt.s32.totalorder (!%p193_p10), %s732_s5, 2  ;;  %s742_s26 = scalar_lea.vmem (!%p193_p10), [#allocation2], %s435_s4 }
  0x14   : > { %p446_p13 = scmp.ne.s32.totalorder (!%p193_p10), %s616_s15, 0 }
  0x17   : > { %s230_s6 = scalar_select %p229_p12, %s732_s5, 2 }
  0x18   : > { %254 = sbr.rel (%p446_p13) target bundleno = 31 (0x1f), region = 36  ;;  %v634_v0 = vmov (!%p446_p13), 0.0  }
  0x19   : > { %s836_s6 = smov (!%p229_p12, %s230_s6), 2  ;;  %255 = vst [vmem:[%s742_s26] sm:$0xff] (!%p446_p13), %v634_v0 }
  0x1a   : > { %s440_s7 = sshll.u32 %s836_s6, 3 }
  0x1b   : > { %s234_s10 = scalar_lea.vmem %s816_s0, %s440_s7  ;;  %s246_s21 = scalar_lea.vmem %s817_s1, %s440_s7 }
  0x1f PF: > { %v256_v1 = vld [vmem:[%s234_s10] sm:$0xff]  ;;  %vm267_vm0 = vcmask 261120   ;;  %v635_v3 = vmov 0   ;;  %v259_v7 = vlaneseq  ;;  %v636_v11 = vmov 0.0   ;;  %s450_s30 = sshll.u32 %s732_s5, 3  ;;  %s452_s4 = sshll.u32 %s620_s16, 7 }
  0x20   : > { %v268_v2 = vsel %vm267_vm0, %v256_v1, -inf  ;;  %531 = vset.pattern.permute.xlu0 %v635_v3  ;;  %v257_v4 = vld [vmem:[%s246_s21] sm:$0xff]  ;;  %v307_v29 = vstv %s450_s30  ;;  %vm311_vm3 = vcmask 7168   ;;  %s344_s6 = sshll.u32 %s742_s26, 4  ;;  %s760_s9 = scalar_lea.hbm %s819_s3, %s452_s4  ;;  %s762_s6 = int_to_ptr.vmem [resolvable:$true] %s344_s6 }
  0x21   : > { %269 = vmax.xlane.f32.xlu0 %v268_v2  ;;  %v260_v9 = vand.u32 127, %v259_v7  ;;  %v448_v14 = vld [vmem:[%s818_s2] ss:$0 sm:$0xff]  ;;  %v306_v27 = vshrl.u32 %v259_v7, 7  ;;  %s331_s10 = scalar_lea.sflag [#allocation3], %s224_s29  ;;  %s538_s16 = scalar_lea.vmem %s762_s6, 128 }
  0x22   : > { %v325_v46 = vld [vmem:[%s742_s26] sm:$0xff]  ;;  %p539_p0 = scmp.ne.s32.totalorder %s762_s6, %s538_s16  ;;  %s637_s11 = smov [#allocation2]  }
  0x23   : > { %v308_v32 = vadd.s32 %v307_v29, %v306_v27  ;;  %vm322_vm4 = vcmp.eq.s32.totalorder %v306_v27, 0  ;;  %vm323_vm5 = vcmp.eq.s32.totalorder %v260_v9, 0  ;;  %s542_s20 = sshll.u32 %s637_s11, 4  ;;  %s543_s20 = int_to_ptr.vmem [resolvable:$false] %s542_s20 }
  0x24   : > { %vm324_vm6 = vmand %vm322_vm4, %vm323_vm5  ;;  %p540_p1 = pnand %p539_p0, %p707_p3  ;;  %s544_s21 = scalar_lea.vmem %s543_s20, 256 }
  0x25   : > { %vm309_vm2 = vcmp.lt.s32.totalorder %v308_v32, 20  ;;  %p545_p4 = scmp.lt.s32.totalorder %s762_s6, %s543_s20  ;;  %p546_p5 = scmp.lt.s32.totalorder %s544_s21, %s538_s16 }
  0x26   : > { %p541_p2 = pneg %p540_p1 }
  0x27   : > { %p547_p6 = por %p546_p5, %p545_p4 }
  0x29   : > { %p548_p7 = pnand %p547_p6, %p541_p2 }
  0x37   : > { %262 = vperm.xlu0 %531, %v257_v4  }
  0xae   : > { %v270_v5 = vpop.xlane.xlu0 %269 }
  0xaf   : > { %v271_v6 = vsub.f32 %v256_v1, %v270_v5 }
  0xb1   : > { %v272_v8 = vmul.f32 1.442695, %v271_v6 }
  0xb3   : > { %532 = vpow2.f32 %v272_v8 }
  0xb6   : > { %v263_v10 = vpop.permute.xlu0 %262 }
  0xb7   : > { %vm264_vm1 = vcmp.eq.s32.totalorder %v260_v9, %v263_v10 }
  0xb8   : > { %v447_v12 = vsel %vm264_vm1, 1.0, %v636_v11 }
  0xb9   : > { %v277_v16 = vmul.f32 %v447_v12, %v271_v6  ;;  %v292_v17 = vmul.f32 %v448_v14, %v447_v12 }
  0xbb   : > { %v278_v18 = vsel %vm267_vm0, %v277_v16, 0.0  ;;  %v293_v19 = vsel %vm267_vm0, %v292_v17, 0.0 }
  0xbd   : > { %v533_v13 = vpop.eup %532 }
  0xbe   : > { %v274_v15 = vsel %vm267_vm0, %v533_v13, 0.0 }
  0xbf   : > { %275 = vadd.xlane.f32.xlu1 %v274_v15 }
  0xc3   : > { %279 = vadd.xlane.f32.xlu1 %v278_v18 }
  0xc7   : > { %294 = vadd.xlane.f32.xlu1 %v293_v19 }
 0x14c   : > { %v276_v20 = vpop.xlane.xlu1 %275 }
 0x14d   : > { %534 = vlog2.f32 %v276_v20 }
 0x150   : > { %v280_v23 = vpop.xlane.xlu1 %279 }
 0x154   : > { %v295_v30 = vpop.xlane.xlu1 %294 }
 0x155   : > { %v299_v34 = vsub.f32 0.0, %v295_v30 }
 0x157   : > { %v535_v21 = vpop.eup %534 }
 0x158   : > { %v282_v22 = vmul.f32 0.6931472, %v535_v21 }
 0x15a   : > { %v283_v24 = vsub.f32 %v280_v23, %v282_v22 }
 0x15c   : > { %v284_v25 = vmul.f32 1.442695, %v283_v24 }
 0x15e   : > { %536 = vpow2.f32 %v284_v25 }
 0x168   : > { %v537_v26 = vpop.eup %536 }
 0x169   : > { %v296_v28 = vsub.f32 1.0, %v537_v26 }
 0x16b   : > { %v297_v31 = vmax.f32 %v296_v28, 0.0 }
 0x16d   : > { %v298_v33 = vmul.f32 %v297_v31, %v297_v31 }
 0x16f   : > { %v300_v35 = vmul.f32 %v299_v34, %v298_v33 }
 0x171   : > { %v301_v36 = vmul.f32 %v300_v35, %v283_v24 }
 0x173   : > { %v310_v37 = vsel %vm309_vm2, %v301_v36, 0.0 }
 0x174   : > { %v312_v38 = vsel %vm311_vm3, %v310_v37, 0.0 }
 0x175   : > { %313 = vadd.xlane.f32.xlu1 %v312_v38 }
 0x202   : > { %v314_v39 = vpop.xlane.xlu1 %313 }
 0x203   : > { %v315_v40 = vrot.slane %v314_v39, 4 }
 0x205   : > { %v316_v41 = vadd.f32 %v315_v40, %v314_v39 }
 0x207   : > { %v317_v42 = vrot.slane %v316_v41, 2 }
 0x209   : > { %v318_v43 = vadd.f32 %v317_v42, %v316_v41 }
 0x20b   : > { %v319_v44 = vrot.slane %v318_v43, 1 }
 0x20d   : > { %v320_v45 = vadd.f32 %v319_v44, %v318_v43 }
 0x20f   : > { %455 = vpush %v320_v45 }
 0x240   : > { %s456_s5 = spop %455 }
 0x241   : > { %v326_v47 = vstv %s456_s5 }
 0x242   : > { %v327_v48 = vsel %vm324_vm6, %v326_v47, 0.0 }
 0x243   : > { %v328_v49 = vadd.f32 %v327_v48, %v325_v46 }
 0x245   : > { %329 = vst [vmem:[%s742_s26] sm:$0xff] %v328_v49 }
 0x246   : > { %551 = shalt.err (!%p548_p7)
}
 0x247   : > { %s552_s29 = scalar_lea.hbm %s760_s9, 128  ;;  %s556_s27 = scalar_lea.hbm %s819_s3, 256 }
 0x248   : > { %p553_p8 = scmp.ne.s32.totalorder %s760_s9, %s552_s29  ;;  %p557_p12 = scmp.lt.u32.totalorder %s760_s9, %s819_s3 }
 0x249   : > { %p558_p13 = scmp.lt.u32.totalorder %s556_s27, %s552_s29  ;;  %p560_p1 = scmp.lt.u32.totalorder %s552_s29, %s760_s9 }
 0x24a   : > { %p554_p10 = pnand %p553_p8, %p707_p3 }
 0x24b   : > { %p559_p0 = por %p558_p13, %p557_p12 }
 0x24c   : > { %p555_p11 = pneg %p554_p10 }
 0x24d   : > { %p561_p2 = por %p560_p1, %p559_p0 }
 0x24f   : > { %p562_p4 = pnand %p561_p2, %p555_p11 }
 0x251   : > { %565 = shalt.err (!%p562_p4)
}
 0x252   : > { %457 = dma.vmem_to_hbm [thread:$0]  (%p707_p3), %s762_s6, 128, %s760_s9, %s331_s10  }
 0x253 PF: > { %p463_p5 = scmp.ge.s32.totalorder %s632_s19, 2  ;;  %s356_s5 = sand.u32 1, %s604_s12  }
 0x254   : > { %s357_s7 = scalar_lea.sflag [#allocation3], %s356_s5 }
 0x255   : > { %p460_p6 = pnand %p463_p5, %p717_p9 }
 0x257   : > { %599 = dma.done.wait (!%p460_p6), %s357_s7, 128  }
 0x258   : > { %601 = vsyncadd (!%p460_p6), %s357_s7, 4294967168  ;;  %s16_s19 = sadd.s32 1, %s632_s19   ;;  %s822_s12 = smov %s608_s13 }
 0x259   : > { %p13_p7 = scmp.ge.s32.totalorder %s16_s19, 6   ;;  %s823_s13 = smov %s612_s14 }
 0x25a   : > { %s824_s14 = smov %s725_s28  ;;  %s825_s15 = smov %s624_s17 }
 0x25b   : > { %s826_s16 = smov %s628_s18  ;;  %s827_s17 = smov %s830_s22 }
 0x25c   : > { %s828_s18 = smov %s834_s23  ;;  %15 = sbr.rel (!%p13_p7) target bundleno = 5 (0x5), region = 74 }
 0x263   :  { %362 = vsyncpa [#allocation3], 1 }
 0x264   :  { %364 = vsyncpa [#allocation3 + $0x1], 1 }

</bundles_post_ra>
